<compile_context>
chip_gen: v7x
topology: tpu7x:2x2x1
jax: 0.10.0
libtpu: 0.0.40
codegen_flags: <defaults>
</compile_context>

<pallas_src>
import functools

import jax
import jax.numpy as jnp
from jax.experimental import pallas as pl
from jax.experimental.pallas import tpu as pltpu

BN_EPS = 1e-5
FPAD = 128          # lane-dense padded feature width


# ----------------------------- Pallas kernel --------------------------------

def _gnn_fused_kernel(adj_ref, x_ref, w1_ref, b1_ref, w2_ref, b2_ref,
                      pool_ref, o_ref, *, num_layers):
    """All GIN layers + global mean pool, fully fused, activations in VMEM."""
    x = x_ref[...]                                    # (Np, FPAD) f32
    for l in range(num_layers):                       # static unroll (small L)
        # neighbor aggregation + self term: A'_l @ x   (A' = A + (1+eps) I)
        x_up = jnp.dot(adj_ref[l], x, preferred_element_type=jnp.float32)
        # Linear + eval BatchNorm, pre-folded into W1'/b1' in glue
        h = jnp.dot(x_up, w1_ref[l], preferred_element_type=jnp.float32)
        h = h + b1_ref[l]
        h = jnp.maximum(h, 0.0)                       # MLP-internal ReLU
        out = jnp.dot(h, w2_ref[l], preferred_element_type=jnp.float32)
        out = out + b2_ref[l]
        if l != num_layers - 1:                       # GNN.act_fn (ReLU)
            out = jnp.maximum(out, 0.0)
        x = out
    # global_mean_pool folded in: pooled = P @ x (reuses VMEM-resident x)
    o_ref[...] = jnp.dot(pool_ref[...], x, preferred_element_type=jnp.float32)


_VMEM = pl.BlockSpec(memory_space=pltpu.MemorySpace.VMEM)


def gnn_forward_fused(adj_stack, x_pad, w1s, b1s, w2s, b2s, pool_pad):
    num_layers = adj_stack.shape[0]
    g_pad = pool_pad.shape[0]
    fpad = x_pad.shape[1]
    kernel = functools.partial(_gnn_fused_kernel, num_layers=num_layers)
    return pl.pallas_call(
        kernel,
        out_shape=jax.ShapeDtypeStruct((g_pad, fpad), jnp.float32),
        in_specs=[_VMEM] * 7,
        out_specs=_VMEM,
    )(adj_stack, x_pad, w1s, b1s, w2s, b2s, pool_pad)


# ------------------------------ glue (prep) ----------------------------------

def _pad_to(a, shape):
    out = jnp.zeros(shape, a.dtype)
    return out.at[tuple(slice(0, s) for s in a.shape)].set(a)


def _round_up(v, m):
    return ((v + m - 1) // m) * m


def prepare_fused_inputs(x, adj, pool_mat, layer_params, fpad=FPAD):
    """Fold BN + eps, pad feature dim to 128, stack per-layer weights."""
    n = x.shape[0]
    g = pool_mat.shape[0]
    n_pad = _round_up(n, 8)
    g_pad = _round_up(max(g, 8), 8)

    x_pad = _pad_to(x, (n_pad, fpad))
    pool_pad = _pad_to(pool_mat, (g_pad, n_pad))

    adjs, w1s, b1s, w2s, b2s = [], [], [], [], []
    eye = jnp.eye(n, dtype=jnp.float32)
    for p in layer_params:
        # fold (1 + eps) * x into the adjacency
        adj_l = adj + (1.0 + p["eps"][0]) * eye
        adjs.append(_pad_to(adj_l, (n_pad, n_pad)))
        # fold eval-mode BatchNorm into the first Linear
        scale = p["gamma"] * jax.lax.rsqrt(p["var"] + BN_EPS)     # (1, out_f)
        w1_f = p["w1"] * scale
        b1_f = (p["b1"] - p["mean"]) * scale + p["beta"]
        w1s.append(_pad_to(w1_f, (fpad, fpad)))
        b1s.append(_pad_to(b1_f, (1, fpad)))
        w2s.append(_pad_to(p["w2"], (fpad, fpad)))
        b2s.append(_pad_to(p["b2"], (1, fpad)))

    return (jnp.stack(adjs), x_pad,
            jnp.stack(w1s), jnp.stack(b1s),
            jnp.stack(w2s), jnp.stack(b2s),
            pool_pad)


def gnn_forward(x, adj, pool_mat, layer_params):
    out_dim = layer_params[-1]["w2"].shape[1]
    g = pool_mat.shape[0]
    inputs = prepare_fused_inputs(x, adj, pool_mat, layer_params)
    pooled_pad = gnn_forward_fused(*inputs)
    return pooled_pad[:g, :out_dim]


# ------------------------------ reference (pure JAX) -------------------------

def _gin_layer_ref(a, x, p, relu_out):
    agg = a @ x
    x_up = (1.0 + p["eps"][0]) * x + agg
    h = x_up @ p["w1"] + p["b1"]
    h = (h - p["mean"]) / jnp.sqrt(p["var"] + BN_EPS) * p["gamma"] + p["beta"]
    h = jnp.maximum(h, 0.0)
    out = h @ p["w2"] + p["b2"]
    return jnp.maximum(out, 0.0) if relu_out else out


def _gnn_ref(x, adj, pool_mat, layer_params):
    n_layers = len(layer_params)
    for i, p in enumerate(layer_params):
        x = _gin_layer_ref(adj, x, p, i != n_layers - 1)
    return pool_mat @ x


# ------------------------------ param / graph setup --------------------------

def _linear_init(key, fan_in, fan_out):
    kw, kb = jax.random.split(key)
    bound = 1.0 / jnp.sqrt(fan_in)
    w = jax.random.uniform(kw, (fan_in, fan_out), jnp.float32, -bound, bound)
    b = jax.random.uniform(kb, (1, fan_out), jnp.float32, -bound, bound)
    return w, b


def make_gin_params(key, in_f, out_f):
    k1, k2 = jax.random.split(key)
    w1, b1 = _linear_init(k1, in_f, out_f)
    w2, b2 = _linear_init(k2, out_f, out_f)
    return {
        "eps": jnp.zeros((1,), jnp.float32),          # GINConv eps (default 0)
        "w1": w1, "b1": b1,
        "gamma": jnp.ones((1, out_f), jnp.float32),   # BN defaults
        "beta": jnp.zeros((1, out_f), jnp.float32),
        "mean": jnp.zeros((1, out_f), jnp.float32),
        "var": jnp.ones((1, out_f), jnp.float32),
        "w2": w2, "b2": b2,
    }


if __name__ == "__main__":
    key = jax.random.PRNGKey(0)

    # "args": input_dim=8, hidden_layers=(32, 32), output_dim=4,
    #         layer_type='GIN', dropout=0.5 (identity at eval), last_layer_fa=False
    input_dim, hidden, output_dim = 8, (32, 32), 4
    dims = [input_dim, *hidden, output_dim]

    N, E, G = 16, 40, 2   # nodes, edges, graphs in the batch

    k_x, k_row, k_col, *k_layers = jax.random.split(key, 3 + len(dims) - 1)

    x = jax.random.normal(k_x, (N, input_dim), jnp.float32)
    row = jax.random.randint(k_row, (E,), 0, N)
    col = jax.random.randint(k_col, (E,), 0, N)
    edge_weight = jnp.ones((E,), jnp.float32)          # unweighted graph
    batch = jnp.concatenate([jnp.zeros((N // 2,), jnp.int32),
                             jnp.ones((N // 2,), jnp.int32)])

    # glue: densify COO adjacency (dst, src) and build mean-pool matrix
    adj = jnp.zeros((N, N), jnp.float32).at[row, col].add(edge_weight)
    one_hot = (batch[None, :] == jnp.arange(G)[:, None]).astype(jnp.float32)
    pool_mat = one_hot / jnp.maximum(one_hot.sum(axis=1, keepdims=True), 1.0)

    layer_params = [make_gin_params(k, i, o)
                    for k, i, o in zip(k_layers, dims[:-1], dims[1:])]

    out = gnn_forward(x, adj, pool_mat, layer_params)
    out = jax.block_until_ready(out)

    ref = _gnn_ref(x, adj, pool_mat, layer_params)
    assert out.shape == (G, output_dim)
    assert jnp.allclose(out, ref, atol=1e-4, rtol=1e-4)

    print("KERNEL_OK")
</pallas_src>

<mosaic_0001>
module attributes {stable_mosaic.version = 11 : i64} {
  func.func @_gnn_fused_kernel(%arg0: memref<3x16x16xf32, #tpu.memory_space<vmem>>, %arg1: memref<16x128xf32, #tpu.memory_space<vmem>>, %arg2: memref<3x128x128xf32, #tpu.memory_space<vmem>>, %arg3: memref<3x1x128xf32, #tpu.memory_space<vmem>>, %arg4: memref<3x128x128xf32, #tpu.memory_space<vmem>>, %arg5: memref<3x1x128xf32, #tpu.memory_space<vmem>>, %arg6: memref<8x16xf32, #tpu.memory_space<vmem>>, %arg7: memref<8x128xf32, #tpu.memory_space<vmem>>) attributes {dimension_semantics = [], scalar_prefetch = 0 : i64, scratch_operands = 0 : i64, tpu.core_type = #tpu.core_type<tc>} {
    %c0 = arith.constant 0 : index
    %c0_0 = arith.constant 0 : index
    %0 = vector.load %arg1[%c0, %c0_0] : memref<16x128xf32, #tpu.memory_space<vmem>>, vector<16x128xf32>
    %c0_1 = arith.constant 0 : index
    %c0_2 = arith.constant 0 : index
    %c0_3 = arith.constant 0 : index
    %1 = vector.load %arg0[%c0_1, %c0_2, %c0_3] : memref<3x16x16xf32, #tpu.memory_space<vmem>>, vector<1x16x16xf32>
    %2 = vector.shape_cast %1 : vector<1x16x16xf32> to vector<16x16xf32>
    %cst = arith.constant dense<0.000000e+00> : vector<16x128xf32>
    %3 = tpu.matmul %2, %0, %cst {dimension_numbers = #tpu.dot_dimension_numbers<[1], [0], [0], [1], [0, 0, 1, 1], [], []>} : vector<16x16xf32>, vector<16x128xf32>, vector<16x128xf32> -> vector<16x128xf32>
    %c0_4 = arith.constant 0 : index
    %c0_5 = arith.constant 0 : index
    %c0_6 = arith.constant 0 : index
    %4 = vector.load %arg2[%c0_4, %c0_5, %c0_6] : memref<3x128x128xf32, #tpu.memory_space<vmem>>, vector<1x128x128xf32>
    %5 = vector.shape_cast %4 : vector<1x128x128xf32> to vector<128x128xf32>
    %cst_7 = arith.constant dense<0.000000e+00> : vector<16x128xf32>
    %6 = tpu.matmul %3, %5, %cst_7 {dimension_numbers = #tpu.dot_dimension_numbers<[1], [0], [0], [1], [0, 0, 1, 1], [], []>} : vector<16x128xf32>, vector<128x128xf32>, vector<16x128xf32> -> vector<16x128xf32>
    %c0_8 = arith.constant 0 : index
    %c0_9 = arith.constant 0 : index
    %c0_10 = arith.constant 0 : index
    %7 = vector.load %arg3[%c0_8, %c0_9, %c0_10] : memref<3x1x128xf32, #tpu.memory_space<vmem>>, vector<1x1x128xf32>
    %8 = vector.shape_cast %7 : vector<1x1x128xf32> to vector<1x128xf32>
    %9 = vector.broadcast %8 : vector<1x128xf32> to vector<16x128xf32>
    %10 = arith.addf %6, %9 : vector<16x128xf32>
    %cst_11 = arith.constant 0.000000e+00 : f32
    %11 = vector.broadcast %cst_11 : f32 to vector<16x128xf32>
    %12 = arith.maximumf %10, %11 : vector<16x128xf32>
    %c0_12 = arith.constant 0 : index
    %c0_13 = arith.constant 0 : index
    %c0_14 = arith.constant 0 : index
    %13 = vector.load %arg4[%c0_12, %c0_13, %c0_14] : memref<3x128x128xf32, #tpu.memory_space<vmem>>, vector<1x128x128xf32>
    %14 = vector.shape_cast %13 : vector<1x128x128xf32> to vector<128x128xf32>
    %cst_15 = arith.constant dense<0.000000e+00> : vector<16x128xf32>
    %15 = tpu.matmul %12, %14, %cst_15 {dimension_numbers = #tpu.dot_dimension_numbers<[1], [0], [0], [1], [0, 0, 1, 1], [], []>} : vector<16x128xf32>, vector<128x128xf32>, vector<16x128xf32> -> vector<16x128xf32>
    %c0_16 = arith.constant 0 : index
    %c0_17 = arith.constant 0 : index
    %c0_18 = arith.constant 0 : index
    %16 = vector.load %arg5[%c0_16, %c0_17, %c0_18] : memref<3x1x128xf32, #tpu.memory_space<vmem>>, vector<1x1x128xf32>
    %17 = vector.shape_cast %16 : vector<1x1x128xf32> to vector<1x128xf32>
    %18 = vector.broadcast %17 : vector<1x128xf32> to vector<16x128xf32>
    %19 = arith.addf %15, %18 : vector<16x128xf32>
    %cst_19 = arith.constant 0.000000e+00 : f32
    %20 = vector.broadcast %cst_19 : f32 to vector<16x128xf32>
    %21 = arith.maximumf %19, %20 : vector<16x128xf32>
    %c1 = arith.constant 1 : index
    %c0_20 = arith.constant 0 : index
    %c0_21 = arith.constant 0 : index
    %22 = vector.load %arg0[%c1, %c0_20, %c0_21] : memref<3x16x16xf32, #tpu.memory_space<vmem>>, vector<1x16x16xf32>
    %23 = vector.shape_cast %22 : vector<1x16x16xf32> to vector<16x16xf32>
    %cst_22 = arith.constant dense<0.000000e+00> : vector<16x128xf32>
    %24 = tpu.matmul %23, %21, %cst_22 {dimension_numbers = #tpu.dot_dimension_numbers<[1], [0], [0], [1], [0, 0, 1, 1], [], []>} : vector<16x16xf32>, vector<16x128xf32>, vector<16x128xf32> -> vector<16x128xf32>
    %c1_23 = arith.constant 1 : index
    %c0_24 = arith.constant 0 : index
    %c0_25 = arith.constant 0 : index
    %25 = vector.load %arg2[%c1_23, %c0_24, %c0_25] : memref<3x128x128xf32, #tpu.memory_space<vmem>>, vector<1x128x128xf32>
    %26 = vector.shape_cast %25 : vector<1x128x128xf32> to vector<128x128xf32>
    %cst_26 = arith.constant dense<0.000000e+00> : vector<16x128xf32>
    %27 = tpu.matmul %24, %26, %cst_26 {dimension_numbers = #tpu.dot_dimension_numbers<[1], [0], [0], [1], [0, 0, 1, 1], [], []>} : vector<16x128xf32>, vector<128x128xf32>, vector<16x128xf32> -> vector<16x128xf32>
    %c1_27 = arith.constant 1 : index
    %c0_28 = arith.constant 0 : index
    %c0_29 = arith.constant 0 : index
    %28 = vector.load %arg3[%c1_27, %c0_28, %c0_29] : memref<3x1x128xf32, #tpu.memory_space<vmem>>, vector<1x1x128xf32>
    %29 = vector.shape_cast %28 : vector<1x1x128xf32> to vector<1x128xf32>
    %30 = vector.broadcast %29 : vector<1x128xf32> to vector<16x128xf32>
    %31 = arith.addf %27, %30 : vector<16x128xf32>
    %cst_30 = arith.constant 0.000000e+00 : f32
    %32 = vector.broadcast %cst_30 : f32 to vector<16x128xf32>
    %33 = arith.maximumf %31, %32 : vector<16x128xf32>
    %c1_31 = arith.constant 1 : index
    %c0_32 = arith.constant 0 : index
    %c0_33 = arith.constant 0 : index
    %34 = vector.load %arg4[%c1_31, %c0_32, %c0_33] : memref<3x128x128xf32, #tpu.memory_space<vmem>>, vector<1x128x128xf32>
    %35 = vector.shape_cast %34 : vector<1x128x128xf32> to vector<128x128xf32>
    %cst_34 = arith.constant dense<0.000000e+00> : vector<16x128xf32>
    %36 = tpu.matmul %33, %35, %cst_34 {dimension_numbers = #tpu.dot_dimension_numbers<[1], [0], [0], [1], [0, 0, 1, 1], [], []>} : vector<16x128xf32>, vector<128x128xf32>, vector<16x128xf32> -> vector<16x128xf32>
    %c1_35 = arith.constant 1 : index
    %c0_36 = arith.constant 0 : index
    %c0_37 = arith.constant 0 : index
    %37 = vector.load %arg5[%c1_35, %c0_36, %c0_37] : memref<3x1x128xf32, #tpu.memory_space<vmem>>, vector<1x1x128xf32>
    %38 = vector.shape_cast %37 : vector<1x1x128xf32> to vector<1x128xf32>
    %39 = vector.broadcast %38 : vector<1x128xf32> to vector<16x128xf32>
    %40 = arith.addf %36, %39 : vector<16x128xf32>
    %cst_38 = arith.constant 0.000000e+00 : f32
    %41 = vector.broadcast %cst_38 : f32 to vector<16x128xf32>
    %42 = arith.maximumf %40, %41 : vector<16x128xf32>
    %c2 = arith.constant 2 : index
    %c0_39 = arith.constant 0 : index
    %c0_40 = arith.constant 0 : index
    %43 = vector.load %arg0[%c2, %c0_39, %c0_40] : memref<3x16x16xf32, #tpu.memory_space<vmem>>, vector<1x16x16xf32>
    %44 = vector.shape_cast %43 : vector<1x16x16xf32> to vector<16x16xf32>
    %cst_41 = arith.constant dense<0.000000e+00> : vector<16x128xf32>
    %45 = tpu.matmul %44, %42, %cst_41 {dimension_numbers = #tpu.dot_dimension_numbers<[1], [0], [0], [1], [0, 0, 1, 1], [], []>} : vector<16x16xf32>, vector<16x128xf32>, vector<16x128xf32> -> vector<16x128xf32>
    %c2_42 = arith.constant 2 : index
    %c0_43 = arith.constant 0 : index
    %c0_44 = arith.constant 0 : index
    %46 = vector.load %arg2[%c2_42, %c0_43, %c0_44] : memref<3x128x128xf32, #tpu.memory_space<vmem>>, vector<1x128x128xf32>
    %47 = vector.shape_cast %46 : vector<1x128x128xf32> to vector<128x128xf32>
    %cst_45 = arith.constant dense<0.000000e+00> : vector<16x128xf32>
    %48 = tpu.matmul %45, %47, %cst_45 {dimension_numbers = #tpu.dot_dimension_numbers<[1], [0], [0], [1], [0, 0, 1, 1], [], []>} : vector<16x128xf32>, vector<128x128xf32>, vector<16x128xf32> -> vector<16x128xf32>
    %c2_46 = arith.constant 2 : index
    %c0_47 = arith.constant 0 : index
    %c0_48 = arith.constant 0 : index
    %49 = vector.load %arg3[%c2_46, %c0_47, %c0_48] : memref<3x1x128xf32, #tpu.memory_space<vmem>>, vector<1x1x128xf32>
    %50 = vector.shape_cast %49 : vector<1x1x128xf32> to vector<1x128xf32>
    %51 = vector.broadcast %50 : vector<1x128xf32> to vector<16x128xf32>
    %52 = arith.addf %48, %51 : vector<16x128xf32>
    %cst_49 = arith.constant 0.000000e+00 : f32
    %53 = vector.broadcast %cst_49 : f32 to vector<16x128xf32>
    %54 = arith.maximumf %52, %53 : vector<16x128xf32>
    %c2_50 = arith.constant 2 : index
    %c0_51 = arith.constant 0 : index
    %c0_52 = arith.constant 0 : index
    %55 = vector.load %arg4[%c2_50, %c0_51, %c0_52] : memref<3x128x128xf32, #tpu.memory_space<vmem>>, vector<1x128x128xf32>
    %56 = vector.shape_cast %55 : vector<1x128x128xf32> to vector<128x128xf32>
    %cst_53 = arith.constant dense<0.000000e+00> : vector<16x128xf32>
    %57 = tpu.matmul %54, %56, %cst_53 {dimension_numbers = #tpu.dot_dimension_numbers<[1], [0], [0], [1], [0, 0, 1, 1], [], []>} : vector<16x128xf32>, vector<128x128xf32>, vector<16x128xf32> -> vector<16x128xf32>
    %c2_54 = arith.constant 2 : index
    %c0_55 = arith.constant 0 : index
    %c0_56 = arith.constant 0 : index
    %58 = vector.load %arg5[%c2_54, %c0_55, %c0_56] : memref<3x1x128xf32, #tpu.memory_space<vmem>>, vector<1x1x128xf32>
    %59 = vector.shape_cast %58 : vector<1x1x128xf32> to vector<1x128xf32>
    %60 = vector.broadcast %59 : vector<1x128xf32> to vector<16x128xf32>
    %61 = arith.addf %57, %60 : vector<16x128xf32>
    %c0_57 = arith.constant 0 : index
    %c0_58 = arith.constant 0 : index
    %62 = vector.load %arg6[%c0_57, %c0_58] : memref<8x16xf32, #tpu.memory_space<vmem>>, vector<8x16xf32>
    %cst_59 = arith.constant dense<0.000000e+00> : vector<8x128xf32>
    %63 = tpu.matmul %62, %61, %cst_59 {dimension_numbers = #tpu.dot_dimension_numbers<[1], [0], [0], [1], [0, 0, 1, 1], [], []>} : vector<8x16xf32>, vector<16x128xf32>, vector<8x128xf32> -> vector<8x128xf32>
    %c0_60 = arith.constant 0 : index
    %c0_61 = arith.constant 0 : index
    %64 = vector.load %arg7[%c0_60, %c0_61] : memref<8x128xf32, #tpu.memory_space<vmem>>, vector<8x128xf32>
    tpu.vector_store %arg7[%c0_60, %c0_61], %63 {strides = array<i32>} : memref<8x128xf32, #tpu.memory_space<vmem>>, vector<8x128xf32>,
    return
  }
}

</mosaic_0001>

<bundles_post_ra>
// kernel: tpu_custom_call.1
= control target key start
LH: loop header
LB: loop body
LE: loop exit
PB: predicated region body
PF: predicated region fallthrough
CT: control target
= control target key end

     0   :  { %12 = vsyncpa [#allocation3], 0  ;;  %s1911_s0 = inlined_call_operand.hbm [shape: f32[3,16,16], index: 0, kind: input, shape index: {}]   ;;  %s1912_s1 = inlined_call_operand.hbm [shape: f32[16,128], index: 1, kind: input, shape index: {}]   ;;  %s1913_s2 = inlined_call_operand.hbm [shape: f32[3,128,128], index: 2, kind: input, shape index: {}]   ;;  %s1914_s3 = inlined_call_operand.vmem [shape: f32[3,1,128], index: 3, kind: input, shape index: {}]   ;;  %s1915_s4 = inlined_call_operand.hbm [shape: f32[3,128,128], index: 4, kind: input, shape index: {}]   ;;  %s1916_s5 = inlined_call_operand.vmem [shape: f32[3,1,128], index: 5, kind: input, shape index: {}]   ;;  %s1917_s6 = inlined_call_operand.vmem [shape: f32[8,16], index: 6, kind: input, shape index: {}]   ;;  %s1918_s7 = inlined_call_operand.hbm [shape: f32[8,128], index: 7, kind: output, shape index: {}]  }
   0x1   :  { %13 = vsyncpa [#allocation6], 0 }
   0x2   :  { %14 = vsyncpa [#allocation9], 0 }
   0x3   :  { %15 = vsyncpa [#allocation4], 0  ;;  %s1747_s24 = smov [#allocation5]   ;;  %s1748_s26 = smov [#allocation2]  }
   0x4   :  { %s33_s25 = sshll.u32 %s1747_s24, 4  ;;  %s21_s27 = sshll.u32 %s1748_s26, 4  ;;  %s34_s25 = int_to_ptr.vmem [resolvable:$true] %s33_s25  ;;  %s1797_s27 = int_to_ptr.vmem [resolvable:$true] %s21_s27 }
   0x5   :  { %s1629_s30 = scalar_lea.hbm %s1912_s1, 256 }
   0x6   :  { %p1630_p0 = scmp.ne.s32.totalorder %s1912_s1, %s1629_s30  ;;  %p1633_p1 = scmp.lt.u32.totalorder %s1629_s30, %s1912_s1 }
   0x8   :  { %p1635_p2 = pnand %p1633_p1, %p1630_p0 }
   0xa   :  { %1638 = shalt.err (!%p1635_p2)
}
   0xb   :  { %s1639_s12 = scalar_lea.vmem %s34_s25, 256  ;;  %p1644_p4 = scmp.lt.s32.totalorder %s34_s25, %s34_s25 }
   0xc   :  { %p1640_p3 = scmp.ne.s32.totalorder %s34_s25, %s1639_s12  ;;  %p1645_p5 = scmp.lt.s32.totalorder %s1639_s12, %s1639_s12 }
   0xe   :  { %p1646_p6 = por %p1645_p5, %p1644_p4 }
  0x10   :  { %p1647_p7 = pnand %p1646_p6, %p1640_p3 }
  0x12   :  { %1650 = shalt.err (!%p1647_p7)
}
  0x13   :  { %s1749_s13 = smov 128   ;;  %s1750_s14 = smov 8  }
  0x14   :  { %39 = dma.hbm_to_vmem [thread:$0]  %s1912_s1, 256, %s34_s25, [#allocation6], %s1749_s13, %s1749_s13, %s1750_s14  }
  0x15   :  { %s1651_s19 = scalar_lea.hbm %s1911_s0, 768 }
  0x16   :  { %p1652_p8 = scmp.ne.s32.totalorder %s1911_s0, %s1651_s19  ;;  %p1655_p9 = scmp.lt.u32.totalorder %s1651_s19, %s1911_s0 }
  0x18   :  { %p1657_p10 = pnand %p1655_p9, %p1652_p8 }
  0x1a   :  { %1660 = shalt.err (!%p1657_p10)
}
  0x1b   :  { %s1661_s24 = scalar_lea.vmem %s1797_s27, 768  ;;  %p1666_p12 = scmp.lt.s32.totalorder %s1797_s27, %s1797_s27 }
  0x1c   :  { %p1662_p11 = scmp.ne.s32.totalorder %s1797_s27, %s1661_s24  ;;  %p1667_p13 = scmp.lt.s32.totalorder %s1661_s24, %s1661_s24 }
  0x1e   :  { %p1668_p0 = por %p1667_p13, %p1666_p12 }
  0x20   :  { %p1669_p1 = pnand %p1668_p0, %p1662_p11 }
  0x22   :  { %1672 = shalt.err (!%p1669_p1)
}
  0x23   :  { %27 = dma.hbm_to_vmem [thread:$0]  %s1911_s0, 768, %s1797_s27, [#allocation3], %s1749_s13, %s1749_s13, %s1750_s14  }
  0x24   :  { %s1751_s26 = smov [#allocation7]   ;;  %s1752_s29 = smov [#allocation8]  }
  0x25   :  { %s45_s28 = sshll.u32 %s1751_s26, 4  ;;  %s59_s30 = sshll.u32 %s1752_s29, 4  ;;  %s46_s28 = int_to_ptr.vmem [resolvable:$true] %s45_s28  ;;  %s1834_s30 = int_to_ptr.vmem [resolvable:$true] %s59_s30 }
  0x26   :  { %s1673_s10 = scalar_lea.hbm %s1913_s2, 6144 }
  0x27   :  { %p1674_p2 = scmp.ne.s32.totalorder %s1913_s2, %s1673_s10  ;;  %p1677_p3 = scmp.lt.u32.totalorder %s1673_s10, %s1913_s2 }
  0x29   :  { %p1679_p4 = pnand %p1677_p3, %p1674_p2 }
  0x2b   :  { %1682 = shalt.err (!%p1679_p4)
}
  0x2c   :  { %s1683_s0 = scalar_lea.vmem %s46_s28, 6144  ;;  %p1688_p6 = scmp.lt.s32.totalorder %s46_s28, %s46_s28 }
  0x2d   :  { %p1684_p5 = scmp.ne.s32.totalorder %s46_s28, %s1683_s0  ;;  %p1689_p7 = scmp.lt.s32.totalorder %s1683_s0, %s1683_s0 }
  0x2f   :  { %p1690_p8 = por %p1689_p7, %p1688_p6 }
  0x31   :  { %p1691_p9 = pnand %p1690_p8, %p1684_p5 }
  0x33   :  { %1694 = shalt.err (!%p1691_p9)
}
  0x34   :  { %51 = dma.hbm_to_vmem [thread:$0]  %s1913_s2, 6144, %s46_s28, [#allocation6], %s1749_s13, %s1749_s13, %s1750_s14  }
  0x35   :  { %s1695_s20 = scalar_lea.hbm %s1915_s4, 6144 }
  0x36   :  { %p1696_p10 = scmp.ne.s32.totalorder %s1915_s4, %s1695_s20  ;;  %p1699_p11 = scmp.lt.u32.totalorder %s1695_s20, %s1915_s4 }
  0x38   :  { %p1701_p12 = pnand %p1699_p11, %p1696_p10 }
  0x3a   :  { %1704 = shalt.err (!%p1701_p12)
}
  0x3b   :  { %s1705_s1 = scalar_lea.vmem %s1834_s30, 6144  ;;  %p1710_p0 = scmp.lt.s32.totalorder %s1834_s30, %s1834_s30 }
  0x3c   :  { %p1706_p13 = scmp.ne.s32.totalorder %s1834_s30, %s1705_s1  ;;  %p1711_p1 = scmp.lt.s32.totalorder %s1705_s1, %s1705_s1 }
  0x3e   :  { %p1712_p2 = por %p1711_p1, %p1710_p0 }
  0x40   :  { %p1713_p3 = pnand %p1712_p2, %p1706_p13 }
  0x42   :  { %1716 = shalt.err (!%p1713_p3)
}
  0x43   :  { %65 = dma.hbm_to_vmem [thread:$0]  %s1915_s4, 6144, %s1834_s30, [#allocation9], %s1749_s13, %s1749_s13, %s1750_s14  }
  0x44   :  { %1739 = dma.done.wait [#allocation3], 768  }
  0x45   :  { %1740 = vsyncadd [#allocation3], 4294966528 }
  0x46   :  { %1741 = dma.done.wait [#allocation6], 6400  }
  0x47   :  { %1742 = vsyncadd [#allocation6], 4294960896 }
  0x48   :  { %1743 = dma.done.wait [#allocation9], 6144  }
  0x49   :  { %1744 = vsyncadd [#allocation9], 4294961152  ;;  %vm86_vm0 = vcmask 130048   ;;  %v82_v0 = vld [vmem:[#allocation5] sm:$0xff]  ;;  %v83_v1 = vld [vmem:[#allocation5 + $0x8] sm:$0xff]  ;;  %vm1754_vm1 = vmmov 0  }
  0x4a   :  { %v84_v2 = vld [vmem:[#allocation2] sm:$0xff]  ;;  %v1412_v3 = vpack.c.bf16 %v83_v1, %v82_v0  ;;  %v169_v5 = vld [vmem:[#allocation7 + $0x8] sm:$0xff]  ;;  %v170_v7 = vld [vmem:[#allocation7 + $0x10] sm:$0xff]  ;;  %s1756_s16 = smov [#allocation10]  }
  0x4b   :  { %1178 = vmatprep.mubr.msk.f32.mxu0 %vm86_vm0, %v84_v2  ;;  %v168_v4 = vld [vmem:[#allocation7] sm:$0xff]  ;;  %v171_v8 = vld [vmem:[#allocation7 + $0x18] sm:$0xff]  ;;  %v173_v11 = vld [vmem:[#allocation7 + $0x28] sm:$0xff]  ;;  %s1023_s0 = sshll.u32 %s1756_s16, 4  ;;  %s1024_s0 = int_to_ptr.vmem [resolvable:$true] %s1023_s0 }
  0x4c   :  { %v1416_v6 = vpack.c.bf16 %v169_v5, %v168_v4  ;;  %1413 = vmatprep.subr.bf16.mxu0 %v1412_v3  ;;  %v1420_v9 = vpack.c.bf16 %v171_v8, %v170_v7  ;;  %v172_v10 = vld [vmem:[#allocation7 + $0x20] sm:$0xff]  ;;  %v85_v12 = vld [vmem:[#allocation2 + $0x8] sm:$0xff]  ;;  %v174_v14 = vld [vmem:[#allocation7 + $0x30] sm:$0xff]  ;;  %s1717_s27 = scalar_lea.vmem %s1024_s0, 128  ;;  %p1722_p5 = scmp.lt.s32.totalorder %s1024_s0, %s1024_s0 }
  0x4d   :  { %1415 = vmatpush3.bf16.msra.mxu0 %v1412_v3  ;;  %v1424_v13 = vpack.c.bf16 %v173_v11, %v172_v10  ;;  %v175_v15 = vld [vmem:[#allocation7 + $0x38] sm:$0xff]  ;;  %v176_v17 = vld [vmem:[#allocation7 + $0x40] sm:$0xff]  ;;  %v177_v18 = vld [vmem:[#allocation7 + $0x48] sm:$0xff]  ;;  %p1718_p4 = scmp.ne.s32.totalorder %s1024_s0, %s1717_s27  ;;  %p1723_p6 = scmp.lt.s32.totalorder %s1717_s27, %s1717_s27 }
  0x4e   :  { %1417 = vmatprep.subr.bf16.mxu1 %v1416_v6  ;;  %v1428_v16 = vpack.c.bf16 %v175_v15, %v174_v14  ;;  %v1432_v19 = vpack.c.bf16 %v177_v18, %v176_v17  ;;  %v178_v20 = vld [vmem:[#allocation7 + $0x50] sm:$0xff]  ;;  %v179_v21 = vld [vmem:[#allocation7 + $0x58] sm:$0xff]  ;;  %v180_v23 = vld [vmem:[#allocation7 + $0x60] sm:$0xff] }
  0x4f   :  { %1419 = vmatpush3.bf16.msra.mxu1 %v1416_v6  ;;  %v1436_v22 = vpack.c.bf16 %v179_v21, %v178_v20  ;;  %v181_v24 = vld [vmem:[#allocation7 + $0x68] sm:$0xff]  ;;  %v182_v26 = vld [vmem:[#allocation7 + $0x70] sm:$0xff]  ;;  %v183_v27 = vld [vmem:[#allocation7 + $0x78] sm:$0xff]  ;;  %p1724_p7 = por %p1723_p6, %p1722_p5 }
  0x50   :  { %1421 = vmatprep.subr.bf16.mxu1 %v1420_v9  ;;  %1179 = vmatmul.mubr.msk.f32.vlgmr.msra.gmra.mrb[0].mxu0 %vm86_vm0, %v85_v12  ;;  %v1440_v25 = vpack.c.bf16 %v181_v24, %v180_v23  ;;  %v1444_v28 = vpack.c.bf16 %v183_v27, %v182_v26  ;;  %v268_v29 = vld [vmem:[#allocation8] sm:$0xff]  ;;  %v269_v30 = vld [vmem:[#allocation8 + $0x8] sm:$0xff]  ;;  %v270_v31 = vld [vmem:[#allocation8 + $0x10] sm:$0xff] }
  0x51   :  { %v1448_v32 = vpack.c.bf16 %v269_v30, %v268_v29  ;;  %v271_v33 = vld [vmem:[#allocation8 + $0x18] sm:$0xff]  ;;  %v272_v35 = vld [vmem:[#allocation8 + $0x20] sm:$0xff]  ;;  %v273_v36 = vld [vmem:[#allocation8 + $0x28] sm:$0xff]  ;;  %p1725_p8 = pnand %p1724_p7, %p1718_p4 }
  0x52   :  { %v1452_v34 = vpack.c.bf16 %v271_v33, %v270_v31  ;;  %v1456_v37 = vpack.c.bf16 %v273_v36, %v272_v35  ;;  %v274_v38 = vld [vmem:[#allocation8 + $0x30] sm:$0xff]  ;;  %v275_v39 = vld [vmem:[#allocation8 + $0x38] sm:$0xff]  ;;  %v276_v41 = vld [vmem:[#allocation8 + $0x40] sm:$0xff] }
  0x53   :  { %1423 = vmatpush3.bf16.msra.mxu1 %v1420_v9  ;;  %1449 = vmatprep.subr.bf16.mxu0 %v1448_v32  ;;  %v1460_v40 = vpack.c.bf16 %v275_v39, %v274_v38  ;;  %v277_v42 = vld [vmem:[#allocation8 + $0x48] sm:$0xff]  ;;  %v278_v44 = vld [vmem:[#allocation8 + $0x50] sm:$0xff]  ;;  %v279_v45 = vld [vmem:[#allocation8 + $0x58] sm:$0xff] }
  0x54   :  { %1425 = vmatprep.subr.bf16.mxu1 %v1424_v13  ;;  %1451 = vmatpush3.bf16.msra.mxu0 %v1448_v32  ;;  %v1464_v43 = vpack.c.bf16 %v277_v42, %v276_v41  ;;  %v1468_v46 = vpack.c.bf16 %v279_v45, %v278_v44  ;;  %v280_v47 = vld [vmem:[#allocation8 + $0x60] sm:$0xff]  ;;  %v281_v48 = vld [vmem:[#allocation8 + $0x68] sm:$0xff]  ;;  %v282_v52 = vld [vmem:[#allocation8 + $0x70] sm:$0xff] }
  0x55   :  { %1453 = vmatprep.subr.bf16.mxu0 %v1452_v34  ;;  %v1472_v49 = vpack.c.bf16 %v281_v48, %v280_v47  ;;  %v283_v53 = vld [vmem:[#allocation8 + $0x78] sm:$0xff]  ;;  %v1036_v55 = vld [vmem:[%s1914_s3] ss:$0 sm:$0xff]  ;;  %v369_v62 = vld [vmem:[#allocation2 + $0x10] sm:$0xff] }
  0x56   :  { %v1476_v54 = vpack.c.bf16 %v283_v53, %v282_v52  ;;  %v453_v63 = vld [vmem:[#allocation7 + $0x80] sm:$0xff]  ;;  %v454_v0 = vld [vmem:[#allocation7 + $0x88] sm:$0xff]  ;;  %v455_v1 = vld [vmem:[#allocation7 + $0x90] sm:$0xff] }
  0x57   :  { %1427 = vmatpush3.bf16.msra.mxu1 %v1424_v13  ;;  %v1484_v2 = vpack.c.bf16 %v454_v0, %v453_v63  ;;  %v456_v3 = vld [vmem:[#allocation7 + $0x98] sm:$0xff]  ;;  %v457_v5 = vld [vmem:[#allocation7 + $0xa0] sm:$0xff]  ;;  %v458_v6 = vld [vmem:[#allocation7 + $0xa8] sm:$0xff] }
  0x58   :  { %1429 = vmatprep.subr.bf16.mxu1 %v1428_v16  ;;  %1455 = vmatpush3.bf16.msra.mxu0 %v1452_v34  ;;  %v1488_v4 = vpack.c.bf16 %v456_v3, %v455_v1  ;;  %v1492_v7 = vpack.c.bf16 %v458_v6, %v457_v5  ;;  %v459_v8 = vld [vmem:[#allocation7 + $0xb0] sm:$0xff]  ;;  %v460_v9 = vld [vmem:[#allocation7 + $0xb8] sm:$0xff]  ;;  %v461_v11 = vld [vmem:[#allocation7 + $0xc0] sm:$0xff] }
  0x59   :  { %1457 = vmatprep.subr.bf16.mxu0 %v1456_v37  ;;  %v1496_v10 = vpack.c.bf16 %v460_v9, %v459_v8  ;;  %v462_v12 = vld [vmem:[#allocation7 + $0xc8] sm:$0xff]  ;;  %v463_v14 = vld [vmem:[#allocation7 + $0xd0] sm:$0xff]  ;;  %v464_v15 = vld [vmem:[#allocation7 + $0xd8] sm:$0xff] }
  0x5a   :  { %v1500_v13 = vpack.c.bf16 %v462_v12, %v461_v11  ;;  %v465_v17 = vld [vmem:[#allocation7 + $0xe0] sm:$0xff]  ;;  %v466_v18 = vld [vmem:[#allocation7 + $0xe8] sm:$0xff]  ;;  %v467_v20 = vld [vmem:[#allocation7 + $0xf0] sm:$0xff] }
  0x5b   :  { %1431 = vmatpush3.bf16.msra.mxu1 %v1428_v16  ;;  %v1504_v16 = vpack.c.bf16 %v464_v15, %v463_v14  ;;  %v468_v21 = vld [vmem:[#allocation7 + $0xf8] sm:$0xff]  ;;  %v1037_v23 = vld [vmem:[%s1916_s5] ss:$0 sm:$0xff]  ;;  %v556_v33 = vld [vmem:[#allocation8 + $0x88] sm:$0xff] }
  0x5c   :  { %1433 = vmatprep.subr.bf16.mxu1 %v1432_v19  ;;  %1459 = vmatpush3.bf16.msra.mxu0 %v1456_v37  ;;  %v370_v31 = vld [vmem:[#allocation2 + $0x18] sm:$0xff]  ;;  %v555_v32 = vld [vmem:[#allocation8 + $0x80] sm:$0xff]  ;;  %v557_v34 = vld [vmem:[#allocation8 + $0x90] sm:$0xff] }
  0x5d   :  { %1461 = vmatprep.subr.bf16.mxu0 %v1460_v40  ;;  %v1516_v35 = vpack.c.bf16 %v556_v33, %v555_v32  ;;  %v558_v36 = vld [vmem:[#allocation8 + $0x98] sm:$0xff]  ;;  %v559_v38 = vld [vmem:[#allocation8 + $0xa0] sm:$0xff]  ;;  %v560_v39 = vld [vmem:[#allocation8 + $0xa8] sm:$0xff] }
  0x5e   :  { %v1520_v37 = vpack.c.bf16 %v558_v36, %v557_v34  ;;  %v561_v41 = vld [vmem:[#allocation8 + $0xb0] sm:$0xff]  ;;  %v562_v42 = vld [vmem:[#allocation8 + $0xb8] sm:$0xff]  ;;  %v563_v44 = vld [vmem:[#allocation8 + $0xc0] sm:$0xff] }
  0x5f   :  { %1435 = vmatpush3.bf16.msra.mxu1 %v1432_v19  ;;  %v1508_v19 = vpack.c.bf16 %v466_v18, %v465_v17  ;;  %v564_v45 = vld [vmem:[#allocation8 + $0xc8] sm:$0xff]  ;;  %v565_v47 = vld [vmem:[#allocation8 + $0xd0] sm:$0xff]  ;;  %v566_v48 = vld [vmem:[#allocation8 + $0xd8] sm:$0xff] }
  0x60   :  { %1437 = vmatprep.subr.bf16.mxu1 %v1436_v22  ;;  %1463 = vmatpush3.bf16.msra.mxu0 %v1460_v40  ;;  %v1524_v40 = vpack.c.bf16 %v560_v39, %v559_v38  ;;  %v657_v1 = vld [vmem:[#allocation2 + $0x20] sm:$0xff]  ;;  %v742_v3 = vld [vmem:[#allocation7 + $0x108] sm:$0xff]  ;;  %v744_v6 = vld [vmem:[#allocation7 + $0x118] sm:$0xff] }
  0x61   :  { %1465 = vmatprep.subr.bf16.mxu0 %v1464_v43  ;;  %v745_v8 = vld [vmem:[#allocation7 + $0x120] sm:$0xff]  ;;  %v746_v9 = vld [vmem:[#allocation7 + $0x128] sm:$0xff]  ;;  %v747_v11 = vld [vmem:[#allocation7 + $0x130] sm:$0xff] }
  0x62   :  { %v748_v12 = vld [vmem:[#allocation7 + $0x138] sm:$0xff]  ;;  %v749_v14 = vld [vmem:[#allocation7 + $0x140] sm:$0xff]  ;;  %v750_v15 = vld [vmem:[#allocation7 + $0x148] sm:$0xff] }
  0x63   :  { %1439 = vmatpush3.bf16.msra.mxu1 %v1436_v22  ;;  %v1512_v22 = vpack.c.bf16 %v468_v21, %v467_v20  ;;  %v751_v17 = vld [vmem:[#allocation7 + $0x150] sm:$0xff]  ;;  %v752_v18 = vld [vmem:[#allocation7 + $0x158] sm:$0xff]  ;;  %v753_v20 = vld [vmem:[#allocation7 + $0x160] sm:$0xff] }
  0x64   :  { %1441 = vmatprep.subr.bf16.mxu1 %v1440_v25  ;;  %1467 = vmatpush3.bf16.msra.mxu0 %v1464_v43  ;;  %v1528_v43 = vpack.c.bf16 %v562_v42, %v561_v41  ;;  %v754_v21 = vld [vmem:[#allocation7 + $0x168] sm:$0xff]  ;;  %v846_v39 = vld [vmem:[#allocation8 + $0x118] sm:$0xff]  ;;  %v847_v41 = vld [vmem:[#allocation8 + $0x120] sm:$0xff] }
  0x65   :  { %1469 = vmatprep.subr.bf16.mxu0 %v1468_v46  ;;  %v658_v34 = vld [vmem:[#allocation2 + $0x28] sm:$0xff] }
  0x66   :  { %v844_v36 = vld [vmem:[#allocation8 + $0x108] sm:$0xff] }
  0x67   :  { %1443 = vmatpush3.bf16.msra.mxu1 %v1440_v25  ;;  %v848_v42 = vld [vmem:[#allocation8 + $0x128] sm:$0xff] }
  0x68   :  { %1445 = vmatprep.subr.bf16.mxu1 %v1444_v28  ;;  %1471 = vmatpush3.bf16.msra.mxu0 %v1468_v46  ;;  %v1532_v46 = vpack.c.bf16 %v564_v45, %v563_v44  ;;  %v849_v44 = vld [vmem:[#allocation8 + $0x130] sm:$0xff]  ;;  %v850_v45 = vld [vmem:[#allocation8 + $0x138] sm:$0xff] }
  0x69   :  { %1473 = vmatprep.subr.bf16.mxu0 %v1472_v49 }
  0x6b   :  { %1447 = vmatpush3.bf16.msra.mxu1 %v1444_v28 }
  0x6c   :  { %1475 = vmatpush3.bf16.msra.mxu0 %v1472_v49  ;;  %v1536_v49 = vpack.c.bf16 %v566_v48, %v565_v47  ;;  %v851_v47 = vld [vmem:[#allocation8 + $0x140] sm:$0xff]  ;;  %v852_v48 = vld [vmem:[#allocation8 + $0x148] sm:$0xff] }
  0x6d   :  { %1477 = vmatprep.subr.bf16.mxu0 %v1476_v54 }
  0x70   :  { %1479 = vmatpush3.bf16.msra.mxu0 %v1476_v54 }
  0x71   :  { %1485 = vmatprep.subr.bf16.mxu0 %v1484_v2 }
 0x123   :  { %v1180_v50 = vpop.f32.mrb[0].mxu0 }
 0x124   :  { %v159_v51 = vpop.f32.mrb[1].mxu0 }
 0x125   :  { %1213 = vmatprep.mubr.f32.mxu1 %v159_v51  ;;  %v568_v51 = vld [vmem:[#allocation8 + $0xe8] sm:$0xff] }
 0x126   :  { %1214 = vmatmul.mubr.f32.vlgmr.msra.gmra.mrb[0].mxu1 %v1180_v50  ;;  %v567_v50 = vld [vmem:[#allocation8 + $0xe0] sm:$0xff] }
 0x127   :  { %1255 = vmatprep.mubr.msk.f32.mxu1 %vm86_vm0, %v369_v62  ;;  %v1540_v52 = vpack.c.bf16 %v568_v51, %v567_v50  ;;  %v853_v50 = vld [vmem:[#allocation8 + $0x150] sm:$0xff]  ;;  %v854_v51 = vld [vmem:[#allocation8 + $0x158] sm:$0xff] }
 0x1f9   :  { %v1215_v56 = vpop.f32.mrb[0].mxu1 }
 0x1fa   :  { %v263_v57 = vadd.f32 %v1215_v56, %v1036_v55  ;;  %v257_v58 = vpop.f32.mrb[1].mxu1  ;;  %v570_v56 = vld [vmem:[#allocation8 + $0xf8] sm:$0xff] }
 0x1fb   :  { %v258_v59 = vadd.f32 %v1036_v55, %v257_v58  ;;  %v569_v55 = vld [vmem:[#allocation8 + $0xf0] sm:$0xff]  ;;  %v1041_v58 = vld [vmem:[%s1914_s3 + $0x1] ss:$0 sm:$0xff] }
 0x1fc   :  { %v267_v61 = vmax.f32 %v263_v57, 0.0  ;;  %v1544_v57 = vpack.c.bf16 %v570_v56, %v569_v55 }
 0x1fd   :  { %v266_v60 = vmax.f32 %v258_v59, 0.0 }
 0x1ff   :  { %1248 = vmatprep.mubr.f32.mxu0 %v266_v60 }
 0x200   :  { %1249 = vmatmul.mubr.f32.vlgmr.msra.gmra.mrb[2].mxu0 %v267_v61 }
 0x201   :  { %1487 = vmatpush3.bf16.msra.mxu0 %v1484_v2  ;;  %v741_v2 = vld [vmem:[#allocation7 + $0x100] sm:$0xff] }
 0x202   :  { %1489 = vmatprep.subr.bf16.mxu0 %v1488_v4  ;;  %v1552_v5 = vpack.c.bf16 %v742_v3, %v741_v2 }
 0x205   :  { %1491 = vmatpush3.bf16.msra.mxu0 %v1488_v4  ;;  %v743_v4 = vld [vmem:[#allocation7 + $0x110] sm:$0xff] }
 0x206   :  { %1493 = vmatprep.subr.bf16.mxu0 %v1492_v7 }
 0x209   :  { %1495 = vmatpush3.bf16.msra.mxu0 %v1492_v7  ;;  %v1556_v7 = vpack.c.bf16 %v744_v6, %v743_v4  ;;  %v1753_v4 = vmov 0.0|0.0   ;;  %v1049_v6 = vld [vmem:[%s1916_s5 + $0x2] ss:$0 sm:$0xff] }
 0x20a   :  { %1497 = vmatprep.subr.bf16.mxu0 %v1496_v10 }
 0x20d   :  { %1499 = vmatpush3.bf16.msra.mxu0 %v1496_v10  ;;  %v1560_v10 = vpack.c.bf16 %v746_v9, %v745_v8 }
 0x20e   :  { %1501 = vmatprep.subr.bf16.mxu0 %v1500_v13 }
 0x211   :  { %1503 = vmatpush3.bf16.msra.mxu0 %v1500_v13  ;;  %v1564_v13 = vpack.c.bf16 %v748_v12, %v747_v11  ;;  %v942_v12 = vld [vmem:[%s1917_s6] sm:$0xff] }
 0x212   :  { %1505 = vmatprep.subr.bf16.mxu0 %v1504_v16 }
 0x215   :  { %1507 = vmatpush3.bf16.msra.mxu0 %v1504_v16  ;;  %v1568_v16 = vpack.c.bf16 %v750_v15, %v749_v14 }
 0x216   :  { %1509 = vmatprep.subr.bf16.mxu0 %v1508_v19 }
 0x219   :  { %1511 = vmatpush3.bf16.msra.mxu0 %v1508_v19  ;;  %v1572_v19 = vpack.c.bf16 %v752_v18, %v751_v17 }
 0x21a   :  { %1513 = vmatprep.subr.bf16.mxu0 %v1512_v22 }
 0x21d   :  { %1515 = vmatpush3.bf16.msra.mxu0 %v1512_v22  ;;  %v1576_v22 = vpack.c.bf16 %v754_v21, %v753_v20 }
 0x2d3   :  { %v1250_v24 = vpop.f32.mrb[2].mxu0 }
 0x2d4   :  { %v363_v25 = vadd.f32 %v1250_v24, %v1037_v23  ;;  %v357_v26 = vpop.f32.mrb[3].mxu0  ;;  %v756_v24 = vld [vmem:[#allocation7 + $0x178] sm:$0xff] }
 0x2d5   :  { %v358_v27 = vadd.f32 %v1037_v23, %v357_v26  ;;  %v755_v23 = vld [vmem:[#allocation7 + $0x170] sm:$0xff]  ;;  %v1043_v26 = vld [vmem:[%s1916_s5 + $0x1] ss:$0 sm:$0xff] }
 0x2d6   :  { %v367_v28 = vmax.f32 %v363_v25, 0.0  ;;  %v1580_v25 = vpack.c.bf16 %v756_v24, %v755_v23 }
 0x2d7   :  { %v366_v29 = vmax.f32 %v358_v27, 0.0 }
 0x2d9   :  { %v1480_v30 = vpack.c.bf16 %v367_v28, %v366_v29 }
 0x2db   :  { %1481 = vmatprep.subr.bf16.mxu1 %v1480_v30 }
 0x2dc   :  { %1483 = vmatpush3.bf16.msra.mxu1 %v1480_v30 }
 0x2dd   :  { %1517 = vmatprep.subr.bf16.mxu1 %v1516_v35 }
 0x2df   :  { %1256 = vmatmul.mubr.msk.f32.vlgmr.msra.gmra.mrb[2].mxu1 %vm86_vm0, %v370_v31 }
 0x2e0   :  { %1519 = vmatpush3.bf16.msra.mxu1 %v1516_v35  ;;  %v843_v35 = vld [vmem:[#allocation8 + $0x100] sm:$0xff] }
 0x2e1   :  { %1521 = vmatprep.subr.bf16.mxu1 %v1520_v37  ;;  %v1584_v38 = vpack.c.bf16 %v844_v36, %v843_v35 }
 0x2e4   :  { %1523 = vmatpush3.bf16.msra.mxu1 %v1520_v37  ;;  %v845_v37 = vld [vmem:[#allocation8 + $0x110] sm:$0xff] }
 0x2e5   :  { %1525 = vmatprep.subr.bf16.mxu1 %v1524_v40 }
 0x2e8   :  { %1527 = vmatpush3.bf16.msra.mxu1 %v1524_v40  ;;  %v1588_v40 = vpack.c.bf16 %v846_v39, %v845_v37 }
 0x2e9   :  { %1529 = vmatprep.subr.bf16.mxu1 %v1528_v43 }
 0x2ec   :  { %1531 = vmatpush3.bf16.msra.mxu1 %v1528_v43  ;;  %v1592_v43 = vpack.c.bf16 %v848_v42, %v847_v41 }
 0x2ed   :  { %1533 = vmatprep.subr.bf16.mxu1 %v1532_v46 }
 0x2f0   :  { %1535 = vmatpush3.bf16.msra.mxu1 %v1532_v46  ;;  %v1596_v46 = vpack.c.bf16 %v850_v45, %v849_v44 }
 0x2f1   :  { %1537 = vmatprep.subr.bf16.mxu1 %v1536_v49 }
 0x2f4   :  { %1539 = vmatpush3.bf16.msra.mxu1 %v1536_v49  ;;  %v1600_v49 = vpack.c.bf16 %v852_v48, %v851_v47 }
 0x2f5   :  { %1541 = vmatprep.subr.bf16.mxu1 %v1540_v52 }
 0x2f8   :  { %1543 = vmatpush3.bf16.msra.mxu1 %v1540_v52  ;;  %v1604_v52 = vpack.c.bf16 %v854_v51, %v853_v50 }
 0x2f9   :  { %1545 = vmatprep.subr.bf16.mxu1 %v1544_v57 }
 0x2fc   :  { %1547 = vmatpush3.bf16.msra.mxu1 %v1544_v57 }
 0x2fd   :  { %1553 = vmatprep.subr.bf16.mxu1 %v1552_v5 }
 0x3b2   :  { %v1257_v53 = vpop.f32.mrb[2].mxu1 }
 0x3b3   :  { %v443_v54 = vpop.f32.mrb[3].mxu1 }
 0x3b4   :  { %1290 = vmatprep.mubr.f32.mxu0 %v443_v54  ;;  %v856_v54 = vld [vmem:[#allocation8 + $0x168] sm:$0xff] }
 0x3b5   :  { %1291 = vmatmul.mubr.f32.vlgmr.msra.gmra.mrb[4].mxu0 %v1257_v53  ;;  %v855_v53 = vld [vmem:[#allocation8 + $0x160] sm:$0xff] }
 0x3b6   :  { %1332 = vmatprep.mubr.msk.f32.mxu0 %vm86_vm0, %v657_v1  ;;  %v1608_v55 = vpack.c.bf16 %v856_v54, %v855_v53 }
 0x488   :  { %v1292_v59 = vpop.f32.mrb[4].mxu0 }
 0x489   :  { %v549_v60 = vadd.f32 %v1292_v59, %v1041_v58  ;;  %v543_v61 = vpop.f32.mrb[5].mxu0  ;;  %v858_v59 = vld [vmem:[#allocation8 + $0x178] sm:$0xff] }
 0x48a   :  { %v544_v62 = vadd.f32 %v1041_v58, %v543_v61  ;;  %v857_v58 = vld [vmem:[#allocation8 + $0x170] sm:$0xff]  ;;  %v1047_v61 = vld [vmem:[%s1914_s3 + $0x2] ss:$0 sm:$0xff] }
 0x48b   :  { %v553_v0 = vmax.f32 %v549_v60, 0.0  ;;  %v1612_v60 = vpack.c.bf16 %v858_v59, %v857_v58 }
 0x48c   :  { %v552_v63 = vmax.f32 %v544_v62, 0.0 }
 0x48e   :  { %1325 = vmatprep.mubr.f32.mxu1 %v552_v63 }
 0x48f   :  { %1326 = vmatmul.mubr.f32.vlgmr.msra.gmra.mrb[4].mxu1 %v553_v0 }
 0x490   :  { %1555 = vmatpush3.bf16.msra.mxu1 %v1552_v5  ;;  %v1755_v5 = vmov 0.0  }
 0x491   :  { %1557 = vmatprep.subr.bf16.mxu1 %v1556_v7 }
 0x494   :  { %1559 = vmatpush3.bf16.msra.mxu1 %v1556_v7 }
 0x495   :  { %1561 = vmatprep.subr.bf16.mxu1 %v1560_v10 }
 0x498   :  { %1563 = vmatpush3.bf16.msra.mxu1 %v1560_v10 }
 0x499   :  { %1565 = vmatprep.subr.bf16.mxu1 %v1564_v13 }
 0x49c   :  { %1567 = vmatpush3.bf16.msra.mxu1 %v1564_v13 }
 0x49d   :  { %1569 = vmatprep.subr.bf16.mxu1 %v1568_v16 }
 0x4a0   :  { %1571 = vmatpush3.bf16.msra.mxu1 %v1568_v16 }
 0x4a1   :  { %1573 = vmatprep.subr.bf16.mxu1 %v1572_v19 }
 0x4a4   :  { %1575 = vmatpush3.bf16.msra.mxu1 %v1572_v19 }
 0x4a5   :  { %1577 = vmatprep.subr.bf16.mxu1 %v1576_v22 }
 0x4a8   :  { %1579 = vmatpush3.bf16.msra.mxu1 %v1576_v22 }
 0x4a9   :  { %1581 = vmatprep.subr.bf16.mxu1 %v1580_v25 }
 0x4ac   :  { %1583 = vmatpush3.bf16.msra.mxu1 %v1580_v25 }
 0x4ad   :  { %1616 = vmatprep.subr.bf16.mxu1 %v1753_v4 }
 0x562   :  { %v1327_v27 = vpop.f32.mrb[4].mxu1 }
 0x563   :  { %v651_v28 = vadd.f32 %v1327_v27, %v1043_v26  ;;  %v645_v29 = vpop.f32.mrb[5].mxu1 }
 0x564   :  { %v646_v30 = vadd.f32 %v1043_v26, %v645_v29 }
 0x565   :  { %v655_v31 = vmax.f32 %v651_v28, 0.0 }
 0x566   :  { %v654_v32 = vmax.f32 %v646_v30, 0.0 }
 0x568   :  { %v1548_v33 = vpack.c.bf16 %v655_v31, %v654_v32 }
 0x56a   :  { %1549 = vmatprep.subr.bf16.mxu0 %v1548_v33 }
 0x56b   :  { %1551 = vmatpush3.bf16.msra.mxu0 %v1548_v33 }
 0x56c   :  { %1585 = vmatprep.subr.bf16.mxu0 %v1584_v38 }
 0x56e   :  { %1333 = vmatmul.mubr.msk.f32.vlgmr.msra.gmra.mrb[6].mxu0 %vm86_vm0, %v658_v34 }
 0x56f   :  { %1587 = vmatpush3.bf16.msra.mxu0 %v1584_v38 }
 0x570   :  { %1589 = vmatprep.subr.bf16.mxu0 %v1588_v40 }
 0x573   :  { %1591 = vmatpush3.bf16.msra.mxu0 %v1588_v40 }
 0x574   :  { %1593 = vmatprep.subr.bf16.mxu0 %v1592_v43 }
 0x577   :  { %1595 = vmatpush3.bf16.msra.mxu0 %v1592_v43 }
 0x578   :  { %1597 = vmatprep.subr.bf16.mxu0 %v1596_v46 }
 0x57b   :  { %1599 = vmatpush3.bf16.msra.mxu0 %v1596_v46 }
 0x57c   :  { %1601 = vmatprep.subr.bf16.mxu0 %v1600_v49 }
 0x57f   :  { %1603 = vmatpush3.bf16.msra.mxu0 %v1600_v49 }
 0x580   :  { %1605 = vmatprep.subr.bf16.mxu0 %v1604_v52 }
 0x583   :  { %1607 = vmatpush3.bf16.msra.mxu0 %v1604_v52 }
 0x584   :  { %1609 = vmatprep.subr.bf16.mxu0 %v1608_v55 }
 0x587   :  { %1611 = vmatpush3.bf16.msra.mxu0 %v1608_v55 }
 0x588   :  { %1613 = vmatprep.subr.bf16.mxu0 %v1612_v60 }
 0x58b   :  { %1615 = vmatpush3.bf16.msra.mxu0 %v1612_v60 }
 0x641   :  { %v1334_v56 = vpop.f32.mrb[6].mxu0 }
 0x642   :  { %v731_v57 = vpop.f32.mrb[7].mxu0 }
 0x643   :  { %1367 = vmatprep.mubr.f32.mxu1 %v731_v57 }
 0x644   :  { %1368 = vmatmul.mubr.f32.vlgmr.msra.gmra.mrb[6].mxu1 %v1334_v56 }
 0x645   :  { %1409 = vmatprep.mubr.msk.f32.mxu1 %vm1754_vm1, %v1755_v5 }
 0x717   :  { %v1369_v62 = vpop.f32.mrb[6].mxu1 }
 0x718   :  { %v837_v63 = vadd.f32 %v1369_v62, %v1047_v61  ;;  %v831_v0 = vpop.f32.mrb[7].mxu1 }
 0x719   :  { %v832_v1 = vadd.f32 %v1047_v61, %v831_v0 }
 0x71a   :  { %v841_v3 = vmax.f32 %v837_v63, 0.0 }
 0x71b   :  { %v840_v2 = vmax.f32 %v832_v1, 0.0 }
 0x71d   :  { %1402 = vmatprep.mubr.f32.mxu0 %v840_v2 }
 0x71e   :  { %1403 = vmatmul.mubr.f32.vlgmr.msra.gmra.mrb[8].mxu0 %v841_v3 }
 0x7f1   :  { %v1404_v7 = vpop.f32.mrb[8].mxu0 }
 0x7f2   :  { %v939_v8 = vadd.f32 %v1404_v7, %v1049_v6  ;;  %v933_v9 = vpop.f32.mrb[9].mxu0 }
 0x7f3   :  { %v934_v10 = vadd.f32 %v1049_v6, %v933_v9 }
 0x7f5   :  { %v1617_v11 = vpack.c.bf16 %v939_v8, %v934_v10 }
 0x7f7   :  { %1618 = vmatpush3.bf16.msra.mxu1 %v1617_v11 }
 0x7fa   :  { %1410 = vmatmul.mubr.msk.f32.vlgmr.msra.gmra.mrb[8].mxu1 %vm86_vm0, %v942_v12 }
 0x8cd   :  { %v1012_v13 = vpop.f32.mrb[8].mxu1 }
 0x8ce   :  { %1016 = vst [vmem:[#allocation10] sm:$0xff] %v1012_v13  ;;  %v1411_v14 = vpop.f32.mrb[9].mxu1 }
 0x8cf   :  { %1728 = shalt.err (!%p1725_p8)
}
 0x8d0   :  { %s1729_s18 = scalar_lea.hbm %s1918_s7, 128 }
 0x8d1   :  { %p1730_p9 = scmp.ne.s32.totalorder %s1918_s7, %s1729_s18  ;;  %p1733_p10 = scmp.lt.u32.totalorder %s1729_s18, %s1918_s7 }
 0x8d3   :  { %p1735_p11 = pnand %p1733_p10, %p1730_p9 }
 0x8d5   :  { %1738 = shalt.err (!%p1735_p11)
}
 0x8d6   :  { %1026 = dma.vmem_to_hbm [thread:$0]  %s1024_s0, 128, %s1918_s7, [#allocation4]  }
 0x8d7   :  { %1745 = dma.done.wait [#allocation4], 128  }
 0x8d8   :  { %1746 = vsyncadd [#allocation4], 4294967168 }
 0x8d9   :  { %1030 = vsyncpa [#allocation3], 1 }
 0x8da   :  { %1031 = vsyncpa [#allocation6], 1 }
 0x8db   :  { %1032 = vsyncpa [#allocation9], 1 }
 0x8dc   :  { %1033 = vsyncpa [#allocation4], 1 }

</bundles_post_ra>
